<compile_context>
chip_gen: v7x
topology: tpu7x:2x2x1
jax: 0.10.0
libtpu: 0.0.40
codegen_flags: <defaults>
</compile_context>

<pallas_src>
import jax
import jax.numpy as jnp
from jax import lax
from jax.experimental import pallas as pl
from jax.experimental.pallas import tpu as pltpu


def _residual_kernel(x_ref, w_ref, b_ref, o_ref):
    # x_ref : (B_blk, C, L)  lane-tile of x for B_blk batch elements
    # w_ref : (C, C)         full weight of fn (1x1 conv): out = W @ x
    # b_ref : (1, C, 1)      bias, broadcast over batch and lanes
    # o_ref : (B_blk, C, L)  output tile = fn(x) + x
    w = w_ref[...]
    bias = b_ref[0].astype(jnp.float32)          # (C, 1)
    b_blk = x_ref.shape[0]                       # static
    for i in range(b_blk):                       # fully unrolled (small B_blk)
        xi = x_ref[i]                            # (C, L)
        # Contract W's ci (axis 1) against x's ci (axis 0) on the MXU with an
        # f32 accumulator; no operand transposes, no explicit upcasts.
        # (Default matmul precision: fine at small C; pass precision=HIGHEST
        # if bit-accurate f32 is ever required.)
        y = lax.dot_general(
            w, xi,
            dimension_numbers=(((1,), (0,)), ((), ())),
            preferred_element_type=jnp.float32,
        )
        o_ref[i] = (y + bias + xi.astype(jnp.float32)).astype(o_ref.dtype)


def _round_up(v, m):
    return ((v + m - 1) // m) * m


def _choose_tiles(B, C, HW_pad, itemsize,
                  tile_budget_bytes=16 << 20, target_tile_bytes=512 << 10):
    """Pick (b_blk, lane_tile).

    tile_budget_bytes bounds the pipelined x+out working set
    (2 buffers * (in + out) = 4 resident copies of one block);
    target_tile_bytes is the per-step x volume we try to reach by folding
    batch elements into the block.
    """
    per_col = C * itemsize                                   # one (C, 1) column
    max_cols = max(128, tile_budget_bytes // (4 * per_col))  # b_blk * lane_tile cap

    # Lane tile: full padded row if it fits the budget, else the largest
    # 128-multiple that does (pl.cdiv grid handles a ragged last tile).
    lane_tile = min(HW_pad, max(128, (max_cols // 128) * 128))

    # Fold batch elements until each step moves ~target_tile_bytes of x.
    target_cols = max(lane_tile, target_tile_bytes // per_col)
    b_blk = int(min(B, max(1, min(max_cols, target_cols) // lane_tile)))

    # Keep >= 2 grid steps on a "parallel" axis so both v7x TensorCores work.
    if pl.cdiv(B, b_blk) * pl.cdiv(HW_pad, lane_tile) < 2:
        if b_blk > 1:
            b_blk = max(1, b_blk // 2)
        elif lane_tile > 128:
            lane_tile = max(128, _round_up(lane_tile // 2, 128))
    return b_blk, lane_tile


def residual_forward(x_nchw, weight, bias):
    """out = fn(x) + x with fn(x) = 1x1-conv(x; weight, bias).

    x_nchw : (B, C, H, W)
    weight : (C, C)   (out_channels, in_channels)
    bias   : (C,)
    """
    B, C, H, W = x_nchw.shape
    HW = H * W
    # (B, C, H, W) -> (B, C, H*W): pure reshape, no transpose / HBM round-trip.
    x3d = x_nchw.reshape(B, C, HW)
    # Pad lane axis to a multiple of 128 so stores are always unmasked vst.
    HW_pad = _round_up(HW, 128)
    if HW_pad != HW:
        x3d = jnp.pad(x3d, ((0, 0), (0, 0), (0, HW_pad - HW)))
    bias3d = bias.reshape(1, C, 1)

    itemsize = jnp.dtype(x3d.dtype).itemsize
    b_blk, lane_tile = _choose_tiles(B, C, HW_pad, itemsize)
    grid = (pl.cdiv(B, b_blk), pl.cdiv(HW_pad, lane_tile))

    # Constant (C,C) weight block: single-buffer it when double-buffering
    # would waste meaningful VMEM (its block index never changes).
    w_spec_kwargs = {}
    if C * C * itemsize >= (2 << 20):
        w_spec_kwargs["pipeline_mode"] = pl.Buffered(1)
    # TODO(synk): for very large C (>= ~2048 f32) the resident (C,C) weight
    # should instead be K-blocked with an "arbitrary" reduction grid axis.

    cost = pl.CostEstimate(
        flops=2 * B * HW_pad * C * C + 2 * B * C * HW_pad,
        transcendentals=0,
        bytes_accessed=(2 * B * C * HW_pad + C * C + C) * itemsize,
    )

    out3d = pl.pallas_call(
        _residual_kernel,
        out_shape=jax.ShapeDtypeStruct((B, C, HW_pad), x3d.dtype),
        grid_spec=pltpu.PrefetchScalarGridSpec(
            num_scalar_prefetch=0,
            grid=grid,
            in_specs=[
                # x block: (B_blk, C, lane_tile)
                pl.BlockSpec((b_blk, C, lane_tile), lambda b, t: (b, 0, t)),
                # full weight, constant block across the whole grid
                pl.BlockSpec((C, C), lambda b, t: (0, 0), **w_spec_kwargs),
                # bias as (1, C, 1): broadcasts over batch and lanes in-kernel
                pl.BlockSpec((1, C, 1), lambda b, t: (0, 0, 0)),
            ],
            out_specs=pl.BlockSpec((b_blk, C, lane_tile), lambda b, t: (b, 0, t)),
        ),
        compiler_params=pltpu.CompilerParams(
            dimension_semantics=("parallel", "parallel"),
            vmem_limit_bytes=48 << 20,   # explicit: v5e default scoped is 16 MiB
        ),
        cost_estimate=cost,
    )(x3d, weight, bias3d)

    if HW_pad != HW:
        out3d = out3d[:, :, :HW]
    # (B, C, H*W) -> (B, C, H, W): free reshape, no transpose.
    return out3d.reshape(B, C, H, W)


def _reference(x, weight, bias):
    # Plain-JAX reference, directly in NCHW.
    return jnp.einsum("oc,bchw->bohw", weight, x) + bias[None, :, None, None] + x


if __name__ == "__main__":
    key = jax.random.PRNGKey(0)
    k1, k2, k3, k4, k5, k6 = jax.random.split(key, 6)

    # Case 1: 16x16 image (H*W already a multiple of 128).
    B, C, H, W = 2, 32, 16, 16
    x = jax.random.normal(k1, (B, C, H, W), dtype=jnp.float32)
    weight = jax.random.normal(k2, (C, C), dtype=jnp.float32) * 0.05
    bias = jax.random.normal(k3, (C,), dtype=jnp.float32) * 0.01
    out = jax.block_until_ready(residual_forward(x, weight, bias))
    assert out.shape == x.shape
    assert jnp.allclose(out, _reference(x, weight, bias), atol=1e-4, rtol=1e-4)

    # Case 2: 7x7 image (H*W = 49) — exercises lane padding and batch folding.
    B2, C2, H2, W2 = 4, 16, 7, 7
    x2 = jax.random.normal(k4, (B2, C2, H2, W2), dtype=jnp.float32)
    weight2 = jax.random.normal(k5, (C2, C2), dtype=jnp.float32) * 0.05
    bias2 = jax.random.normal(k6, (C2,), dtype=jnp.float32) * 0.01
    out2 = jax.block_until_ready(residual_forward(x2, weight2, bias2))
    assert out2.shape == x2.shape
    assert jnp.allclose(out2, _reference(x2, weight2, bias2), atol=1e-4, rtol=1e-4)

    print("KERNEL_OK")
</pallas_src>

<mosaic_0001>
module attributes {stable_mosaic.version = 11 : i64} {
  func.func @_residual_kernel(%arg0: i32, %arg1: i32, %arg2: memref<1x32x256xf32, #tpu.memory_space<vmem>>, %arg3: memref<32x32xf32, #tpu.memory_space<vmem>>, %arg4: memref<1x32x1xf32, #tpu.memory_space<vmem>>, %arg5: memref<1x32x256xf32, #tpu.memory_space<vmem>>) attributes {dimension_semantics = [#tpu.dimension_semantics<parallel>, #tpu.dimension_semantics<parallel>], iteration_bounds = array<i64: 2, 1>, scalar_prefetch = 0 : i64, scratch_operands = 0 : i64, tpu.core_type = #tpu.core_type<tc>, window_params = [{transform_indices = @transform_0, window_bounds = array<i64: 1, 32, 256>}, {pipeline_mode = #tpu.pipeline_mode<synchronous>, transform_indices = @transform_1, window_bounds = array<i64: 32, 32>}, {pipeline_mode = #tpu.pipeline_mode<synchronous>, transform_indices = @transform_2, window_bounds = array<i64: 1, 32, 1>}, {transform_indices = @transform_3, window_bounds = array<i64: 1, 32, 256>}]} {
    %c0 = arith.constant 0 : index
    %c0_0 = arith.constant 0 : index
    %0 = vector.load %arg3[%c0, %c0_0] : memref<32x32xf32, #tpu.memory_space<vmem>>, vector<32x32xf32>
    %c0_1 = arith.constant 0 : index
    %c0_2 = arith.constant 0 : index
    %c0_3 = arith.constant 0 : index
    %1 = vector.load %arg4[%c0_1, %c0_2, %c0_3] : memref<1x32x1xf32, #tpu.memory_space<vmem>>, vector<1x32x1xf32>
    %2 = vector.shape_cast %1 : vector<1x32x1xf32> to vector<32x1xf32>
    %c0_4 = arith.constant 0 : index
    %c0_5 = arith.constant 0 : index
    %c0_6 = arith.constant 0 : index
    %3 = vector.load %arg2[%c0_4, %c0_5, %c0_6] : memref<1x32x256xf32, #tpu.memory_space<vmem>>, vector<1x32x256xf32>
    %4 = vector.shape_cast %3 : vector<1x32x256xf32> to vector<32x256xf32>
    %cst = arith.constant dense<0.000000e+00> : vector<32x256xf32>
    %5 = tpu.matmul %0, %4, %cst {dimension_numbers = #tpu.dot_dimension_numbers<[1], [0], [0], [1], [0, 0, 1, 1], [], []>} : vector<32x32xf32>, vector<32x256xf32>, vector<32x256xf32> -> vector<32x256xf32>
    %6 = vector.broadcast %2 : vector<32x1xf32> to vector<32x256xf32>
    %7 = arith.addf %5, %6 : vector<32x256xf32>
    %8 = arith.addf %7, %4 : vector<32x256xf32>
    %c0_7 = arith.constant 0 : index
    %c0_8 = arith.constant 0 : index
    %c0_9 = arith.constant 0 : index
    %9 = vector.load %arg5[%c0_7, %c0_8, %c0_9] : memref<1x32x256xf32, #tpu.memory_space<vmem>>, vector<1x32x256xf32>
    %10 = vector.shape_cast %9 : vector<1x32x256xf32> to vector<32x256xf32>
    %11 = vector.shape_cast %8 : vector<32x256xf32> to vector<1x32x256xf32>
    tpu.vector_store %arg5[%c0_7, %c0_8, %c0_9], %11 {strides = array<i32>} : memref<1x32x256xf32, #tpu.memory_space<vmem>>, vector<1x32x256xf32>,
    return
  }
  func.func @transform_0(%arg0: i32, %arg1: i32) -> (i32, i32, i32) {
    %c0_i32 = arith.constant 0 : i32
    %c0_i32_0 = arith.constant 0 : i32
    return %arg0, %c0_i32, %arg1 : i32, i32, i32
  }
  func.func @transform_1(%arg0: i32, %arg1: i32) -> (i32, i32) {
    %c0_i32 = arith.constant 0 : i32
    %c0_i32_0 = arith.constant 0 : i32
    %c0_i32_1 = arith.constant 0 : i32
    return %c0_i32, %c0_i32_0 : i32, i32
  }
  func.func @transform_2(%arg0: i32, %arg1: i32) -> (i32, i32, i32) {
    %c0_i32 = arith.constant 0 : i32
    %c0_i32_0 = arith.constant 0 : i32
    %c0_i32_1 = arith.constant 0 : i32
    %c0_i32_2 = arith.constant 0 : i32
    return %c0_i32, %c0_i32_0, %c0_i32_1 : i32, i32, i32
  }
  func.func @transform_3(%arg0: i32, %arg1: i32) -> (i32, i32, i32) {
    %c0_i32 = arith.constant 0 : i32
    %c0_i32_0 = arith.constant 0 : i32
    return %arg0, %c0_i32, %arg1 : i32, i32, i32
  }
}

</mosaic_0001>

<bundles_post_ra>
// kernel: tpu_custom_call.1
= control target key start
LH: loop header
LB: loop body
LE: loop exit
PB: predicated region body
PF: predicated region fallthrough
CT: control target
= control target key end

     0   :  { %8 = vsyncpa [#allocation3], 0  ;;  %s926_s0 = inlined_call_operand.hbm [shape: f32[2,32,256], index: 0, kind: input, shape index: {}]   ;;  %s927_s1 = inlined_call_operand.vmem [shape: f32[32,32], index: 1, kind: input, shape index: {}]   ;;  %s928_s2 = inlined_call_operand.vmem [shape: f32[1,32,1], index: 2, kind: input, shape index: {}]   ;;  %s929_s3 = inlined_call_operand.hbm [shape: f32[2,32,256], index: 3, kind: output, shape index: {}]  }
   0x1   :  { %10 = vsyncpa [#allocation3 + $0x1], 0 }
   0x2   :  { %11 = vsyncpa [#allocation4], 0 }
   0x3   :  { %13 = vsyncpa [#allocation4 + $0x1], 0  ;;  %s711_s12 = smov 0   ;;  %s713_s13 = smov 0  }
   0x4   :  { %s715_s14 = smov 0   ;;  %s717_s15 = smov 0  }
   0x5   :  { %s719_s16 = smov 0   ;;  %s721_s17 = smov 0  }
   0x6 LB: > { %s466_s18 = sadd.s32 4294967295, %s681_s17   ;;  %s467_s19 = sadd.s32 4294967294, %s681_s17   ;;  %s681_s17 = sphi %s721_s17, %s19_s17   ;;  %s677_s16 = sphi %s719_s16, %s944_s16   ;;  %s673_s15 = sphi %s717_s15, %s943_s15   ;;  %s669_s14 = sphi %s715_s14, %s942_s14   ;;  %s665_s13 = sphi %s713_s13, %s941_s13   ;;  %s661_s12 = sphi %s711_s12, %s940_s12  }
   0x7   : > { %s31_s20 = sadd.s32 1, %s677_s16  ;;  %s40_s21 = sadd.s32 1, %s669_s14 }
   0x8   : > { %p33_p0 = scmp.ge.s32.totalorder %s31_s20, 2  ;;  %p47_p1 = scmp.ne.s32.totalorder %s669_s14, %s665_s13 }
   0x9   : > { %p48_p2 = scmp.eq.s32.totalorder %s681_s17, 0  ;;  %p53_p3 = scmp.ne.s32.totalorder %s665_s13, %s661_s12 }
   0xa   : > { %s946_s20 = smov (%p33_p0, %s31_s20), 0  ;;  %p54_p5 = scmp.eq.s32.totalorder %s466_s18, 0 }
   0xb   : > { %p752_p4 = por %p48_p2, %p47_p1  ;;  %s35_s23 = ssub.s32 %s677_s16, %s946_s20 }
   0xc   : > { %p121_p6 = scmp.eq.s32.totalorder %s466_s18, 1  ;;  %p38_p7 = scmp.eq.s32.totalorder %s35_s23, 0 }
   0xd   : > { %p758_p8 = por %p54_p5, %p53_p3  ;;  %p127_p10 = scmp.eq.s32.totalorder %s467_s19, 1 }
   0xe   : > { %p762_p9 = por %p121_p6, %p47_p1  ;;  %p511_p13 = scmp.lt.s32.totalorder %s681_s17, 2 }
   0xf   : > { %s767_s26 = scalar_select %p38_p7, %s669_s14, %s40_s21  }
  0x10   : > { %s933_s25 = scalar_select %p762_p9, 1, 0 }
  0x11   : > { %p769_p11 = por %p127_p10, %p53_p3  ;;  %s153_s28 = sand.u32 1, %s669_s14  }
  0x12   : > { %s470_s29 = sshll.u32 %s153_s28, 6  ;;  %s485_s30 = sshll.u32 %s677_s16, 10 }
  0x13   : > { %s934_s27 = scalar_select %p769_p11, 1, 0 }
  0x14   : > { %s780_s6 = scalar_lea.hbm %s926_s0, %s485_s30  ;;  %s157_s7 = scalar_lea.vmem [#allocation2], %s470_s29 }
  0x15   : > { %s166_s8 = sshll.u32 %s157_s7, 4  ;;  %p786_p0 = pnand %p511_p13, %p752_p4  ;;  %s782_s8 = int_to_ptr.vmem [resolvable:$true] %s166_s8 }
  0x16   : > { %s791_s10 = scalar_lea.sflag [#allocation3], %s153_s28  ;;  %s569_s11 = scalar_lea.hbm %s780_s6, 1024 }
  0x17   : > { %p570_p2 = scmp.ne.s32.totalorder %s780_s6, %s569_s11  ;;  %p571_p3 = pneg %p786_p0 }
  0x18   : > { %s574_s21 = scalar_lea.hbm %s926_s0, 2048  ;;  %p575_p4 = scmp.lt.u32.totalorder %s780_s6, %s926_s0 }
  0x19   : > { %p572_p5 = pnand %p571_p3, %p570_p2  ;;  %p576_p7 = scmp.lt.u32.totalorder %s574_s21, %s569_s11 }
  0x1a   : > { %p578_p13 = scmp.lt.u32.totalorder %s569_s11, %s780_s6 }
  0x1b   : > { %p573_p6 = pneg %p572_p5  ;;  %p577_p10 = por %p576_p7, %p575_p4 }
  0x1d   : > { %p579_p12 = por %p578_p13, %p577_p10 }
  0x1f   : > { %p580_p1 = pnand %p579_p12, %p573_p6 }
  0x21   : > { %583 = shalt.err (!%p580_p1)
}
  0x22   : > { %s584_s28 = scalar_lea.vmem %s782_s8, 1024  ;;  %s683_s29 = smov [#allocation2]  }
  0x23   : > { %p585_p2 = scmp.ne.s32.totalorder %s782_s8, %s584_s28  ;;  %s589_s30 = sshll.u32 %s683_s29, 4  ;;  %s590_s30 = int_to_ptr.vmem [resolvable:$false] %s589_s30 }
  0x24   : > { %s591_s4 = scalar_lea.vmem %s590_s30, 2048  ;;  %p592_p9 = scmp.lt.s32.totalorder %s782_s8, %s590_s30 }
  0x25   : > { %p587_p5 = pnand %p585_p2, %p571_p3  ;;  %p593_p4 = scmp.lt.s32.totalorder %s591_s4, %s584_s28 }
  0x27   : > { %p588_p11 = pneg %p587_p5  ;;  %p594_p7 = por %p593_p4, %p592_p9 }
  0x29   : > { %p595_p10 = pnand %p594_p7, %p588_p11 }
  0x2b   : > { %598 = shalt.err (!%p595_p10)
}
  0x2c   : > { %s684_s5 = smov 256   ;;  %s685_s7 = smov 16  }
  0x2d   : > { %506 = dma.hbm_to_vmem [thread:$0]  (!%p786_p0), %s780_s6, 1024, %s782_s8, %s791_s10, %s684_s5, %s684_s5, %s685_s7  }
  0x2e   : > { %p174_p12 = scmp.lt.s32.totalorder %s681_s17, 3  ;;  %p936_p1 = scmp.ge.s32.totalorder %s681_s17, 1 }
  0x30   : > { %p175_p3 = pnand %p936_p1, %p174_p12 }
  0x31   : > { %s823_s11 = sand.u32 (!%p175_p3), 1, %s665_s13  }
  0x32   : > { %178 = sbr.rel (%p175_p3) target bundleno = 305 (0x131), region = 32  ;;  %s474_s18 = sshll.u32 (!%p175_p3), %s823_s11, 6 }
  0x33   : > { %s181_s19 = scalar_lea.sflag (!%p175_p3), [#allocation3], %s823_s11  ;;  %s184_s21 = scalar_lea.vmem (!%p175_p3), [#allocation2], %s474_s18 }
  0x39   : > { %652 = dma.done.wait (%p758_p8), %s181_s19, 1024  }
  0x3a   : > { %654 = vsyncadd (%p758_p8), %s181_s19, 4294966272  ;;  %v686_v0 = vmov 0.0   ;;  %v687_v1 = vmov 0   ;;  %v218_v2 = vld [vmem:[%s184_s21 + $0x8] sm:$0xff]  ;;  %v833_v3 = vld [vmem:[%s184_s21 + $0x18] sm:$0xff]  ;;  %vm245_vm0 = vcmask 261120  }
  0x3b   : > { %322 = vmatprep.mubr.f32.mxu0 %v686_v0  ;;  %334 = vmatprep.mubr.f32.mxu1 %v686_v0  ;;  %v217_v4 = vld [vmem:[%s184_s21] sm:$0xff]  ;;  %v487_v5 = vpack.c.bf16 %v833_v3, %v218_v2  ;;  %v836_v6 = vld [vmem:[%s184_s21 + $0x10] sm:$0xff]  ;;  %v222_v7 = vld [vmem:[%s184_s21 + $0x28] sm:$0xff]  ;;  %s206_s6 = scalar_lea.vmem [#allocation5], %s474_s18  ;;  %s486_s9 = sshll.u32 %s673_s15, 10 }
  0x3c   : > { %568 = vset.pattern.permute.xlu1 %v687_v1  ;;  %567 = vset.pattern.permute.xlu0 %v687_v1  ;;  %v838_v8 = vld [vmem:[%s184_s21 + $0x38] sm:$0xff]  ;;  %v489_v9 = vpack.c.bf16 %v836_v6, %v217_v4  ;;  %v221_v11 = vld [vmem:[%s184_s21 + $0x20] sm:$0xff]  ;;  %v223_v12 = vld [vmem:[%s184_s21 + $0x30] sm:$0xff]  ;;  %s379_s8 = sshll.u32 %s206_s6, 4  ;;  %s875_s10 = scalar_lea.hbm %s929_s3, %s486_s9  ;;  %s869_s8 = int_to_ptr.vmem [resolvable:$true] %s379_s8 }
  0x3d   : > { %v491_v10 = vpack.c.bf16 %v838_v8, %v222_v7  ;;  %488 = vmatprep.subr.bf16.mxu0 %v487_v5  ;;  %495 = vmatprep.subr.bf16.mxu1 %v487_v5  ;;  %v493_v13 = vpack.c.bf16 %v223_v12, %v221_v11  ;;  %v215_v14 = vld [vmem:[%s928_s2 + $0x10] sm:$0xff]  ;;  %v213_v15 = vld [vmem:[%s928_s2] sm:$0xff]  ;;  %v216_v16 = vld [vmem:[%s928_s2 + $0x18] sm:$0xff]  ;;  %s364_s22 = scalar_lea.sflag [#allocation4], %s823_s11  ;;  %s599_s23 = scalar_lea.vmem %s869_s8, 1024 }
  0x3e   : > { %490 = vmatpush1.bf16.msra.mxu0 %v489_v9  ;;  %497 = vmatpush1.bf16.msra.mxu1 %v489_v9  ;;  %v214_v17 = vld [vmem:[%s928_s2 + $0x8] sm:$0xff]  ;;  %v209_v18 = vld [vmem:[%s927_s1] sm:$0xff]  ;;  %v211_v19 = vld [vmem:[%s927_s1 + $0x10] sm:$0xff]  ;;  %p600_p8 = scmp.ne.s32.totalorder %s869_s8, %s599_s23  ;;  %p937_p9 = scmp.ne.s32.totalorder %s933_s25, 0 }
  0x3f   : > { %492 = vmatprep.subr.bf16.mxu0 %v491_v10  ;;  %496 = vmatprep.subr.bf16.mxu1 %v491_v10  ;;  %v210_v20 = vld [vmem:[%s927_s1 + $0x8] sm:$0xff]  ;;  %v212_v21 = vld [vmem:[%s927_s1 + $0x18] sm:$0xff]  ;;  %s688_s28 = smov [#allocation5]  }
  0x40   : > { %237 = vperm.xlu1 %568, %v215_v14   ;;  %227 = vperm.xlu0 %567, %v213_v15   ;;  %p601_p11 = pnand %p600_p8, %p937_p9  ;;  %s603_s29 = sshll.u32 %s688_s28, 4  ;;  %s604_s29 = int_to_ptr.vmem [resolvable:$false] %s603_s29 }
  0x41   : > { %s605_s30 = scalar_lea.vmem %s604_s29, 2048  ;;  %p606_p6 = scmp.lt.s32.totalorder %s869_s8, %s604_s29 }
  0x42   : > { %494 = vmatpush1.bf16.msra.mxu0 %v493_v13  ;;  %498 = vmatpush1.bf16.msra.mxu1 %v493_v13  ;;  %p602_p0 = pneg %p601_p11  ;;  %p607_p13 = scmp.lt.s32.totalorder %s605_s30, %s599_s23 }
  0x44   : > { %242 = vperm.xlu1 %568, %v216_v16   ;;  %232 = vperm.xlu0 %567, %v214_v17   ;;  %p608_p2 = por %p607_p13, %p606_p6 }
  0x45   : > { %476 = vmatmul.mubr.msk.f32.vlgmr.msra.gmra.mrb[0].mxu0 %vm245_vm0, %v209_v18  ;;  %478 = vmatmul.mubr.msk.f32.vlgmr.msra.gmra.mrb[0].mxu1 %vm245_vm0, %v211_v19 }
  0x46   : > { %328 = vmatprep.mubr.f32.mxu0 %v686_v0  ;;  %340 = vmatprep.mubr.f32.mxu1 %v686_v0  ;;  %p609_p5 = pnand %p608_p2, %p602_p0 }
  0x49   : > { %477 = vmatmul.mubr.msk.f32.gmra.mrb[2].mxu0 %vm245_vm0, %v210_v20  ;;  %479 = vmatmul.mubr.msk.f32.gmra.mrb[2].mxu1 %vm245_vm0, %v212_v21 }
  0xbf   : > { %v238_v22 = vpop.permute.xlu1 %237  ;;  %v228_v23 = vpop.permute.xlu0 %227 }
  0xc3   : > { %v243_v34 = vpop.permute.xlu1 %242  ;;  %v233_v35 = vpop.permute.xlu0 %232 }
 0x118   : > { %v324_v24 = vpop.f32.mrb[0].mxu0  ;;  %v336_v25 = vpop.f32.mrb[0].mxu1 }
 0x119   : > { %v325_v26 = vadd.f32 %v324_v24, %v228_v23  ;;  %v337_v27 = vadd.f32 %v336_v25, %v238_v22  ;;  %v326_v28 = vpop.f32.mrb[1].mxu0  ;;  %v338_v29 = vpop.f32.mrb[1].mxu1 }
 0x11a   : > { %v327_v30 = vadd.f32 %v326_v28, %v228_v23  ;;  %v339_v31 = vadd.f32 %v338_v29, %v238_v22 }
 0x11b   : > { %v347_v32 = vadd.f32 %v325_v26, %v217_v4  ;;  %v351_v33 = vadd.f32 %v337_v27, %v221_v11 }
 0x11c   : > { %v348_v36 = vadd.f32 %v327_v30, %v218_v2  ;;  %v352_v37 = vadd.f32 %v339_v31, %v222_v7  ;;  %v330_v38 = vpop.f32.mrb[2].mxu0  ;;  %v342_v39 = vpop.f32.mrb[2].mxu1 }
 0x11d   : > { %355 = vst [vmem:[%s206_s6] sm:$0xff] %v347_v32  ;;  %359 = vst [vmem:[%s206_s6 + $0x20] sm:$0xff] %v351_v33  ;;  %v331_v40 = vadd.f32 %v330_v38, %v233_v35  ;;  %v343_v41 = vadd.f32 %v342_v39, %v243_v34  ;;  %v332_v42 = vpop.f32.mrb[3].mxu0  ;;  %v344_v43 = vpop.f32.mrb[3].mxu1 }
 0x11e   : > { %356 = vst [vmem:[%s206_s6 + $0x8] sm:$0xff] %v348_v36  ;;  %360 = vst [vmem:[%s206_s6 + $0x28] sm:$0xff] %v352_v37  ;;  %v333_v44 = vadd.f32 %v332_v42, %v233_v35  ;;  %v345_v45 = vadd.f32 %v344_v43, %v243_v34 }
 0x11f   : > { %v349_v46 = vadd.f32 %v331_v40, %v836_v6  ;;  %v353_v47 = vadd.f32 %v343_v41, %v223_v12 }
 0x120   : > { %v350_v48 = vadd.f32 %v333_v44, %v833_v3  ;;  %v354_v49 = vadd.f32 %v345_v45, %v838_v8 }
 0x121   : > { %357 = vst [vmem:[%s206_s6 + $0x10] sm:$0xff] %v349_v46  ;;  %361 = vst [vmem:[%s206_s6 + $0x30] sm:$0xff] %v353_v47 }
 0x122   : > { %358 = vst [vmem:[%s206_s6 + $0x18] sm:$0xff] %v350_v48  ;;  %362 = vst [vmem:[%s206_s6 + $0x38] sm:$0xff] %v354_v49 }
 0x123   : > { %612 = shalt.err (!%p609_p5)
}
 0x124   : > { %s613_s4 = scalar_lea.hbm %s875_s10, 1024  ;;  %s617_s19 = scalar_lea.hbm %s929_s3, 2048 }
 0x125   : > { %p614_p4 = scmp.ne.s32.totalorder %s875_s10, %s613_s4  ;;  %p618_p12 = scmp.lt.u32.totalorder %s875_s10, %s929_s3 }
 0x126   : > { %p619_p1 = scmp.lt.u32.totalorder %s617_s19, %s613_s4  ;;  %p621_p8 = scmp.lt.u32.totalorder %s613_s4, %s875_s10 }
 0x127   : > { %p615_p7 = pnand %p614_p4, %p937_p9 }
 0x128   : > { %p620_p3 = por %p619_p1, %p618_p12 }
 0x129   : > { %p616_p10 = pneg %p615_p7 }
 0x12a   : > { %p622_p11 = por %p621_p8, %p620_p3 }
 0x12c   : > { %p623_p0 = pnand %p622_p11, %p616_p10 }
 0x12e   : > { %626 = shalt.err (!%p623_p0)
}
 0x12f   : > { %s689_s6 = smov 256   ;;  %s690_s9 = smov 16  }
 0x130   : > { %501 = dma.vmem_to_hbm [thread:$0]  (%p937_p9), %s869_s8, 1024, %s875_s10, %s364_s22, %s689_s6, %s689_s6, %s690_s9  }
 0x131 PF: > { %s394_s15 = sand.u32 1, %s661_s12   ;;  %p938_p6 = scmp.ne.s32.totalorder %s934_s27, 0 }
 0x132   : > { %p939_p13 = scmp.ge.s32.totalorder %s681_s17, 2  ;;  %s395_s18 = scalar_lea.sflag [#allocation4], %s394_s15 }
 0x134   : > { %p508_p2 = pnand %p939_p13, %p938_p6 }
 0x136   : > { %656 = dma.done.wait (!%p508_p2), %s395_s18, 1024  }
 0x137   : > { %658 = vsyncadd (!%p508_p2), %s395_s18, 4294966272  ;;  %s19_s17 = sadd.s32 1, %s681_s17   ;;  %s940_s12 = smov %s665_s13 }
 0x138   : > { %p16_p5 = scmp.ge.s32.totalorder %s19_s17, 4   ;;  %s941_s13 = smov %s669_s14 }
 0x139   : > { %s942_s14 = smov %s767_s26  ;;  %s943_s15 = smov %s677_s16 }
 0x13a   : > { %s944_s16 = smov %s946_s20  ;;  %18 = sbr.rel (!%p16_p5) target bundleno = 6 (0x6), region = 77 }
 0x141   :  { %400 = vsyncpa [#allocation3], 1 }
 0x142   :  { %402 = vsyncpa [#allocation3 + $0x1], 1 }
 0x143   :  { %403 = vsyncpa [#allocation4], 1 }
 0x144   :  { %405 = vsyncpa [#allocation4 + $0x1], 1 }

</bundles_post_ra>
